<compile_context>
chip_gen: v7x
topology: tpu7x:2x2x1
jax: 0.10.0
libtpu: 0.0.40
codegen_flags: <defaults>
</compile_context>

<pallas_src>
import math
from functools import partial

import jax
import jax.numpy as jnp
from jax.experimental import pallas as pl
from jax.experimental.pallas import tpu as pltpu


def gcn_kernel(adj_ref, x_ref, w_ref, b_ref, o_ref, agg_ref, *, c_in, tk, x_resident):
    k = pl.program_id(1)

    @pl.when(k == 0)
    def _init():
        agg_ref[...] = jnp.zeros_like(agg_ref)

    # Adjacency tile: compact dtype at rest (int8 / fp8 / bf16) -> bf16 for the
    # bf16 MXU path; the convert hides under the tile's HBM DMA.
    a = adj_ref[...].astype(jnp.bfloat16)                       # (tm, tk)

    if x_resident:
        # X lives fully in VMEM; slice the k-chunk (aligned, tk is a lane multiple).
        xk = x_ref[pl.ds(pl.multiple_of(k * tk, tk), tk), :]    # (tk, c_in+1)
    else:
        xk = x_ref[...]                                         # (tk, c_in+1), streamed

    # One MXU matmul produces both the neighbor feature sums (cols [0, c_in)) and
    # the row degree (last, all-ones column of X).  f32 accumulation.
    agg_ref[...] += jnp.dot(a, xk, preferred_element_type=jnp.float32)

    @pl.when(k == pl.num_programs(1) - 1)
    def _finalize():
        acc = agg_ref[...]                                      # (tm, c_in+1) f32
        feats = acc[:, :c_in]
        deg = jnp.maximum(acc[:, c_in:], 1.0)                   # isolated nodes -> mean over {} = 0
        mean = feats / deg                                      # exact f32 normalize
        out = jnp.dot(mean, w_ref[...], preferred_element_type=jnp.float32)  # f32 finalize
        o_ref[...] = (out + b_ref[...]).astype(o_ref.dtype)


def gcn_conv(x, adj, weight, bias, *, tm=512, tk=2048, x_resident_bytes=16 << 20):
    """x: [N, C_in] f32, adj: [N, N] 0/1 (any dtype; int8/fp8/bf16 at rest preferred),
    weight: [C_in, C_out] f32, bias: [C_out] f32."""
    n, c_in = x.shape
    c_out = weight.shape[1]
    c_in_p = c_in + 1

    # Clamp tiles for small graphs; keep sublane/lane-friendly granularity
    # (32 rows covers int8 packing, 128 cols covers the lane dim).
    tm = max(32, min(tm, pl.cdiv(n, 32) * 32))
    tk = max(128, min(tk, pl.cdiv(n, 128) * 128))
    grid = (pl.cdiv(n, tm), pl.cdiv(n, tk))
    k_pad = grid[1] * tk

    # Small operands only: pack an all-ones column into X (degree via the MXU),
    # cast to bf16, zero-pad the node axis to k_pad.  The zero padding makes the
    # adjacency's out-of-bounds columns harmless, so adj itself is neither cast
    # nor padded (no extra full pass over the N^2 stream).
    x_packed = jnp.concatenate([x, jnp.ones((n, 1), x.dtype)], axis=1)
    x_packed = jnp.pad(x_packed.astype(jnp.bfloat16), ((0, k_pad - n), (0, 0)))
    w = weight.astype(jnp.float32)                # resident, f32 finalize matmul
    b2 = bias.reshape(1, c_out).astype(jnp.float32)

    x_resident = (k_pad * c_in_p * 2) <= x_resident_bytes
    if x_resident:
        x_spec = pl.BlockSpec((k_pad, c_in_p), lambda i, k: (0, 0))   # VMEM-resident
    else:
        x_spec = pl.BlockSpec((tk, c_in_p), lambda i, k: (k, 0))      # streamed per k-tile

    itemsize = lambda a: jnp.dtype(a.dtype).itemsize
    cost = pl.CostEstimate(
        flops=2 * n * n * c_in_p + 2 * n * c_in * c_out,
        transcendentals=0,
        bytes_accessed=int(adj.size * itemsize(adj)
                           + x_packed.size * itemsize(x_packed)
                           + w.size * 4 + c_out * 4
                           + n * c_out * itemsize(x)),
    )

    out = pl.pallas_call(
        partial(gcn_kernel, c_in=c_in, tk=tk, x_resident=x_resident),
        out_shape=jax.ShapeDtypeStruct((n, c_out), x.dtype),
        grid=grid,
        in_specs=[
            pl.BlockSpec((tm, tk), lambda i, k: (i, k)),        # adj tile (dominant HBM stream)
            x_spec,                                             # X (+ ones column)
            pl.BlockSpec((c_in, c_out), lambda i, k: (0, 0)),   # weight (resident, f32)
            pl.BlockSpec((1, c_out), lambda i, k: (0, 0)),      # bias (resident)
        ],
        out_specs=pl.BlockSpec((tm, c_out), lambda i, k: (i, 0)),
        scratch_shapes=[pltpu.VMEM((tm, c_in_p), jnp.float32)],  # [sums | degree] accumulator
        compiler_params=pltpu.CompilerParams(
            dimension_semantics=("parallel", "arbitrary"),
        ),
        cost_estimate=cost,
    )(adj, x_packed, w, b2)
    return out


def glorot(key, shape):
    # Matches torch_geometric glorot: uniform(-a, a), a = sqrt(6 / (fan_in + fan_out))
    a = math.sqrt(6.0 / (shape[0] + shape[1]))
    return jax.random.uniform(key, shape, dtype=jnp.float32, minval=-a, maxval=a)


if __name__ == "__main__":
    key = jax.random.PRNGKey(0)
    k_x, k_adj, k_w, k_rw = jax.random.split(key, 4)

    N = 200          # not a tile multiple -> exercises the ragged-edge path
    C_IN = 16
    C_OUT = 32

    x = jax.random.normal(k_x, (N, C_IN), dtype=jnp.float32)
    # Adjacency stored compactly at rest (int8 0/1): the kernel streams it directly
    # from HBM -- no wrapper-side cast or pad pass over the N^2 array.
    adj = (jax.random.uniform(k_adj, (N, N)) < 0.1).astype(jnp.int8)

    weight = glorot(k_w, (C_IN, C_OUT))
    root_weight = glorot(k_rw, (C_IN, C_OUT))  # initialized per __init__, unused in forward
    bias = jnp.zeros((C_OUT,), dtype=jnp.float32)

    # Small tiles so the (2, 2) grid exercises the tiled accumulate / finalize path;
    # real graphs use the larger defaults (tm=512, tk=2048+).
    out = gcn_conv(x, adj, weight, bias, tm=128, tk=128)
    out = jax.block_until_ready(out)

    # f32 reference (kernel uses bf16 X on the MXU; accumulate + finalize in f32).
    adj_f = adj.astype(jnp.float32)
    deg = jnp.maximum(adj_f.sum(axis=-1, keepdims=True), 1.0)
    ref = (adj_f @ x) / deg @ weight + bias
    assert out.shape == (N, C_OUT)
    max_err = float(jnp.max(jnp.abs(out - ref)))
    assert jnp.allclose(out, ref, atol=1e-2, rtol=1e-2), max_err

    print("KERNEL_OK")
</pallas_src>

<mosaic_0001>
module attributes {stable_mosaic.version = 11 : i64} {
  func.func @gcn_kernel(%arg0: i32, %arg1: i32, %arg2: memref<128x128xi8, #tpu.memory_space<vmem>>, %arg3: memref<256x17xbf16, #tpu.memory_space<vmem>>, %arg4: memref<16x32xf32, #tpu.memory_space<vmem>>, %arg5: memref<1x32xf32, #tpu.memory_space<vmem>>, %arg6: memref<128x32xf32, #tpu.memory_space<vmem>>, %arg7: memref<128x17xf32, #tpu.memory_space<vmem>>) attributes {dimension_semantics = [#tpu.dimension_semantics<parallel>, #tpu.dimension_semantics<arbitrary>], iteration_bounds = array<i64: 2, 2>, scalar_prefetch = 0 : i64, scratch_operands = 1 : i64, tpu.core_type = #tpu.core_type<tc>, window_params = [{transform_indices = @transform_0, window_bounds = array<i64: 128, 128>}, {pipeline_mode = #tpu.pipeline_mode<synchronous>, transform_indices = @transform_1, window_bounds = array<i64: 256, 17>}, {pipeline_mode = #tpu.pipeline_mode<synchronous>, transform_indices = @transform_2, window_bounds = array<i64: 16, 32>}, {pipeline_mode = #tpu.pipeline_mode<synchronous>, transform_indices = @transform_3, window_bounds = array<i64: 1, 32>}, {transform_indices = @transform_4, window_bounds = array<i64: 128, 32>}]} {
    %c0_i32 = arith.constant 0 : i32
    %0 = arith.cmpi eq, %arg1, %c0_i32 : i32
    %1 = arith.extui %0 : i1 to i32
    %c0_i32_0 = arith.constant 0 : i32
    %2 = arith.cmpi ne, %1, %c0_i32_0 : i32
    scf.if %2 {
      %cst_8 = arith.constant 0.000000e+00 : f32
      %16 = vector.broadcast %cst_8 : f32 to vector<128x17xf32>
      %c0_9 = arith.constant 0 : index
      %c0_10 = arith.constant 0 : index
      %17 = vector.load %arg7[%c0_9, %c0_10] : memref<128x17xf32, #tpu.memory_space<vmem>>, vector<128x17xf32>
      tpu.vector_store %arg7[%c0_9, %c0_10], %16 {strides = array<i32>} : memref<128x17xf32, #tpu.memory_space<vmem>>, vector<128x17xf32>,
    } else {
    }
    %c0 = arith.constant 0 : index
    %c0_1 = arith.constant 0 : index
    %3 = vector.load %arg2[%c0, %c0_1] : memref<128x128xi8, #tpu.memory_space<vmem>>, vector<128x128xi8>
    %4 = arith.sitofp %3 : vector<128x128xi8> to vector<128x128xbf16>
    %c128_i32 = arith.constant 128 : i32
    %5 = arith.muli %arg1, %c128_i32 : i32
    %6 = tpu.assume_multiple %5, 128 : i32
    %7 = arith.index_cast %6 : i32 to index
    %c0_2 = arith.constant 0 : index
    %8 = vector.load %arg3[%7, %c0_2] : memref<256x17xbf16, #tpu.memory_space<vmem>>, vector<128x17xbf16>
    %c0_3 = arith.constant 0 : index
    %c0_4 = arith.constant 0 : index
    %9 = vector.load %arg7[%c0_3, %c0_4] : memref<128x17xf32, #tpu.memory_space<vmem>>, vector<128x17xf32>
    %cst = arith.constant dense<0.000000e+00> : vector<128x17xf32>
    %10 = tpu.matmul %4, %8, %cst {dimension_numbers = #tpu.dot_dimension_numbers<[1], [0], [0], [1], [0, 0, 1, 1], [], []>} : vector<128x128xbf16>, vector<128x17xbf16>, vector<128x17xf32> -> vector<128x17xf32>
    %11 = arith.addf %9, %10 : vector<128x17xf32>
    %c0_5 = arith.constant 0 : index
    %c0_6 = arith.constant 0 : index
    %12 = vector.load %arg7[%c0_5, %c0_6] : memref<128x17xf32, #tpu.memory_space<vmem>>, vector<128x17xf32>
    tpu.vector_store %arg7[%c0_5, %c0_6], %11 {strides = array<i32>} : memref<128x17xf32, #tpu.memory_space<vmem>>, vector<128x17xf32>,
    %c1_i32 = arith.constant 1 : i32
    %13 = arith.cmpi eq, %arg1, %c1_i32 : i32
    %14 = arith.extui %13 : i1 to i32
    %c0_i32_7 = arith.constant 0 : i32
    %15 = arith.cmpi ne, %14, %c0_i32_7 : i32
    scf.if %15 {
      %c0_8 = arith.constant 0 : index
      %c0_9 = arith.constant 0 : index
      %16 = vector.load %arg7[%c0_8, %c0_9] : memref<128x17xf32, #tpu.memory_space<vmem>>, vector<128x17xf32>
      %17 = vector.extract_strided_slice %16 {offsets = [0, 0], sizes = [128, 16], strides = [1, 1]} : vector<128x17xf32> to vector<128x16xf32>
      %18 = vector.extract_strided_slice %16 {offsets = [0, 16], sizes = [128, 1], strides = [1, 1]} : vector<128x17xf32> to vector<128x1xf32>
      %cst_10 = arith.constant 1.000000e+00 : f32
      %19 = vector.broadcast %cst_10 : f32 to vector<128x1xf32>
      %20 = arith.maximumf %18, %19 : vector<128x1xf32>
      %21 = vector.broadcast %20 : vector<128x1xf32> to vector<128x16xf32>
      %22 = arith.divf %17, %21 : vector<128x16xf32>
      %c0_11 = arith.constant 0 : index
      %c0_12 = arith.constant 0 : index
      %23 = vector.load %arg4[%c0_11, %c0_12] : memref<16x32xf32, #tpu.memory_space<vmem>>, vector<16x32xf32>
      %cst_13 = arith.constant dense<0.000000e+00> : vector<128x32xf32>
      %24 = tpu.matmul %22, %23, %cst_13 {dimension_numbers = #tpu.dot_dimension_numbers<[1], [0], [0], [1], [0, 0, 1, 1], [], []>} : vector<128x16xf32>, vector<16x32xf32>, vector<128x32xf32> -> vector<128x32xf32>
      %c0_14 = arith.constant 0 : index
      %c0_15 = arith.constant 0 : index
      %25 = vector.load %arg5[%c0_14, %c0_15] : memref<1x32xf32, #tpu.memory_space<vmem>>, vector<1x32xf32>
      %26 = vector.broadcast %25 : vector<1x32xf32> to vector<128x32xf32>
      %27 = arith.addf %24, %26 : vector<128x32xf32>
      %c0_16 = arith.constant 0 : index
      %c0_17 = arith.constant 0 : index
      %28 = vector.load %arg6[%c0_16, %c0_17] : memref<128x32xf32, #tpu.memory_space<vmem>>, vector<128x32xf32>
      tpu.vector_store %arg6[%c0_16, %c0_17], %27 {strides = array<i32>} : memref<128x32xf32, #tpu.memory_space<vmem>>, vector<128x32xf32>,
    } else {
    }
    return
  }
  func.func @transform_0(%arg0: i32, %arg1: i32) -> (i32, i32) {
    %c0_i32 = arith.constant 0 : i32
    return %arg0, %arg1 : i32, i32
  }
  func.func @transform_1(%arg0: i32, %arg1: i32) -> (i32, i32) {
    %c0_i32 = arith.constant 0 : i32
    %c0_i32_0 = arith.constant 0 : i32
    %c0_i32_1 = arith.constant 0 : i32
    return %c0_i32, %c0_i32_0 : i32, i32
  }
  func.func @transform_2(%arg0: i32, %arg1: i32) -> (i32, i32) {
    %c0_i32 = arith.constant 0 : i32
    %c0_i32_0 = arith.constant 0 : i32
    %c0_i32_1 = arith.constant 0 : i32
    return %c0_i32, %c0_i32_0 : i32, i32
  }
  func.func @transform_3(%arg0: i32, %arg1: i32) -> (i32, i32) {
    %c0_i32 = arith.constant 0 : i32
    %c0_i32_0 = arith.constant 0 : i32
    %c0_i32_1 = arith.constant 0 : i32
    return %c0_i32, %c0_i32_0 : i32, i32
  }
  func.func @transform_4(%arg0: i32, %arg1: i32) -> (i32, i32) {
    %c0_i32 = arith.constant 0 : i32
    %c0_i32_0 = arith.constant 0 : i32
    return %arg0, %c0_i32 : i32, i32
  }
}

</mosaic_0001>

<bundles_post_ra>
// kernel: tpu_custom_call.1
= control target key start
LH: loop header
LB: loop body
LE: loop exit
PB: predicated region body
PF: predicated region fallthrough
CT: control target
= control target key end

     0   :  { %s2576_s0 = inlined_call_operand.vmem [shape: s8[200,200], index: 0, kind: input, shape index: {}]   ;;  %s2577_s1 = inlined_call_operand.vmem [shape: bf16[256,17], index: 1, kind: input, shape index: {}]   ;;  %s2578_s2 = inlined_call_operand.vmem [shape: f32[16,32], index: 2, kind: input, shape index: {}]   ;;  %s2579_s3 = inlined_call_operand.vmem [shape: f32[1,32], index: 3, kind: input, shape index: {}]   ;;  %s2580_s4 = inlined_call_operand.vmem [shape: f32[200,32], index: 4, kind: output, shape index: {}]  }
   0x1   :  { %2583 = sst [smem:[#allocation7_spill]] %s2576_s0 }
   0x2   :  { %s2085_s15 = smov 0   ;;  %s2087_s16 = smov 0  }
   0x3   :  { %s2089_s17 = smov 0   ;;  %s2091_s18 = smov 0  }
   0x4   :  { %s2093_s19 = smov 0   ;;  %s2095_s20 = smov 0  }
   0x5   :  { %s2097_s21 = smov 0   ;;  %s2099_s22 = smov 0  }
   0x6   :  { %s2101_s23 = smov 0  }
   0x7 LB: > { %s23_s24 = sadd.s32 1, %s1984_s21  ;;  %s26_s25 = sadd.s32 1, %s1988_s22  ;;  %s1992_s23 = sphi %s2101_s23, %s14_s23   ;;  %s1988_s22 = sphi %s2099_s22, %s2604_s22   ;;  %s1984_s21 = sphi %s2097_s21, %s2603_s21   ;;  %s1980_s20 = sphi %s2095_s20, %s2602_s20   ;;  %s1976_s19 = sphi %s2093_s19, %s2601_s19   ;;  %s1972_s18 = sphi %s2091_s18, %s2600_s18   ;;  %s1968_s17 = sphi %s2089_s17, %s2599_s17   ;;  %s1964_s16 = sphi %s2087_s16, %s2598_s16   ;;  %s1960_s15 = sphi %s2085_s15, %s2597_s15  }
   0x8   : > { %p24_p0 = scmp.ge.s32.totalorder %s23_s24, 2  ;;  %p42_p1 = scmp.ne.s32.totalorder %s1972_s18, %s1968_s17 }
   0x9   : > { %s1415_s26 = sadd.s32 4294967295, %s1992_s23   ;;  %p43_p2 = scmp.eq.s32.totalorder %s1992_s23, 0 }
   0xa   : > { %s2606_s24 = smov (%p24_p0, %s23_s24), 0  ;;  %s2608_s25 = smov (!%p24_p0, %s26_s25), %s1988_s22 }
   0xb   : > { %2584 = sst [smem:[#allocation5_spill]] %s2606_s24  ;;  %p28_p3 = scmp.ge.s32.totalorder %s2608_s25, 2 }
   0xc   : > { %s31_s27 = ssub.s32 %s1984_s21, %s2606_s24  ;;  %p2141_p4 = por %p43_p2, %p42_p1 }
   0xd   : > { %p134_p5 = scmp.ne.s32.totalorder %s1964_s16, %s1960_s15  ;;  %s2610_s25 = smov (%p28_p3, %s2608_s25), 0 }
   0xe   : > { %2586 = sst [smem:[#allocation6_spill]] %s2610_s25  ;;  %s35_s29 = sadd.s32 1, %s1972_s18 }
   0xf   : > { %p135_p6 = scmp.eq.s32.totalorder %s1415_s26, 3  ;;  %s30_s30 = ssub.s32 %s1988_s22, %s2610_s25 }
  0x10   : > { %s124_s5 = sadd.s32 1, %s1964_s16  ;;  %s32_s6 = sor.u32 %s31_s27, %s30_s30 }
  0x11   : > { %p122_p7 = scmp.eq.s32.totalorder %s30_s30, 0  ;;  %p33_p8 = scmp.eq.s32.totalorder %s32_s6, 0 }
  0x12   : > { %p2153_p9 = por %p135_p6, %p134_p5  ;;  %p1418_p10 = scmp.ge.s32.totalorder %s1992_s23, 4 }
  0x13   : > { %s2158_s8 = scalar_select %p122_p7, %s1964_s16, %s124_s5  }
  0x14   : > { %s2161_s9 = scalar_select %p33_p8, %s1972_s18, %s35_s29  }
  0x15   : > { %166 = sbr.rel (%p1418_p10) target bundleno = 96 (0x60), region = 28 }
  0x1c   : > { %169 = sbr.rel (!%p2141_p4) target bundleno = 96 (0x60), region = 32  ;;  %s171_s10 = sand.u32 (%p2141_p4), 1, %s1972_s18  }
  0x1d   : > { %s1420_s11 = sshll.u32 (%p2141_p4), %s1988_s22, 4  ;;  %s1419_s12 = sshll.u32 (%p2141_p4), %s171_s10, 5 }
  0x1e   : > { %s175_s13 = ssub.s32 (%p2141_p4), 25, %s1420_s11  ;;  %s1492_s14 = sshll.u32 (%p2141_p4), %s1988_s22, 5 }
  0x1f   : > { %p176_p11 = scmp.lt.s32.totalorder (%p2141_p4), %s175_s13, 16  ;;  %s181_s26 = sadd.s32 (%p2141_p4), %s1984_s21, %s1492_s14 }
  0x20   : > { %s1424_s29 = sshll.u32 (%p2141_p4), %s181_s26, 1  ;;  %s2588_s0 = sld [smem:[#allocation7_spill]] (%p2141_p4) }
  0x21   : > { %s2178_s6 = scalar_lea.vmem (%p2141_p4), [#allocation3], %s1419_s12  }
  0x23   : > { %s2612_s13 = smov (!%p176_p11, %s175_s13), 16 }
  0x24   : > { %s1421_s27 = sshll.u32 %s2612_s13, 5 }
  0x25   : > { %p1425_p12 = scmp.eq.s32.totalorder %s1421_s27, 0 }
  0x26   : > { %s2176_s28 = scalar_lea.vmem %s2588_s0, %s1424_s29   ;;  %s2181_s10 = sshrl.u32 (!%p1425_p12), %s2612_s13, 4 }
  0x27   : > { %186 = sbr.rel (%p1425_p12) target bundleno = 96 (0x60), region = 36  ;;  %p1426_p13 = scmp.le.s32.totalorder (!%p1425_p12), %s2181_s10, 0 }
  0x2e   : > { %1332 = sbr.rel (%p1426_p13) target bundleno = 75 (0x4b), region = 190  ;;  %s2589_s11 = smov (!%p1426_p13), %s2178_s6 }
  0x2f   : > { %s2590_s14 = smov (!%p1426_p13), %s2176_s28  ;;  %s2190_s26 = smov (!%p1426_p13), 0  }
  0x30   : > { %s2192_s29 = smov (!%p1426_p13), 0  }
  0x35 LB: >> { %v202_v0 = vld [vmem:[%s2000_s14] sm:$0x3]  ;;  %v204_v1 = vld [vmem:[%s2000_s14 + $0x4] sm:$0x3]  ;;  %v206_v2 = vld [vmem:[%s2000_s14 + $0x8] sm:$0x3]  ;;  %s2008_s29 = sphi %s2192_s29, %s196_s29   ;;  %s2004_s26 = sphi %s2190_s26, %s2591_s26   ;;  %s2000_s14 = sphi %s2590_s14, %s239_s14   ;;  %s1996_s11 = sphi %s2589_s11, %s240_s11  }
  0x36   : >> { %203 = vst [vmem:[%s1996_s11] sm:$0x3] %v202_v0  ;;  %205 = vst [vmem:[%s1996_s11 + $0x2] sm:$0x3] %v204_v1  ;;  %v208_v3 = vld [vmem:[%s2000_s14 + $0xc] sm:$0x3]  ;;  %s234_s12 = sadd.s32 1, %s2004_s26 }
  0x37   : >> { %207 = vst [vmem:[%s1996_s11 + $0x4] sm:$0x3] %v206_v2  ;;  %v210_v4 = vld [vmem:[%s2000_s14 + $0x10] sm:$0x3]  ;;  %v212_v5 = vld [vmem:[%s2000_s14 + $0x14] sm:$0x3]  ;;  %p235_p0 = scmp.ge.s32.totalorder %s234_s12, %s2181_s10 }
  0x38   : >> { %209 = vst [vmem:[%s1996_s11 + $0x6] sm:$0x3] %v208_v3  ;;  %211 = vst [vmem:[%s1996_s11 + $0x8] sm:$0x3] %v210_v4  ;;  %v214_v6 = vld [vmem:[%s2000_s14 + $0x18] sm:$0x3] }
  0x39   : >> { %213 = vst [vmem:[%s1996_s11 + $0xa] sm:$0x3] %v212_v5  ;;  %v216_v7 = vld [vmem:[%s2000_s14 + $0x1c] sm:$0x3]  ;;  %v218_v8 = vld [vmem:[%s2000_s14 + $0x20] sm:$0x3] }
  0x3a   : >> { %215 = vst [vmem:[%s1996_s11 + $0xc] sm:$0x3] %v214_v6  ;;  %217 = vst [vmem:[%s1996_s11 + $0xe] sm:$0x3] %v216_v7  ;;  %v220_v9 = vld [vmem:[%s2000_s14 + $0x24] sm:$0x3] }
  0x3b   : >> { %219 = vst [vmem:[%s1996_s11 + $0x10] sm:$0x3] %v218_v8  ;;  %v222_v10 = vld [vmem:[%s2000_s14 + $0x28] sm:$0x3]  ;;  %v224_v11 = vld [vmem:[%s2000_s14 + $0x2c] sm:$0x3] }
  0x3c   : >> { %221 = vst [vmem:[%s1996_s11 + $0x12] sm:$0x3] %v220_v9  ;;  %223 = vst [vmem:[%s1996_s11 + $0x14] sm:$0x3] %v222_v10  ;;  %v226_v12 = vld [vmem:[%s2000_s14 + $0x30] sm:$0x3] }
  0x3d   : >> { %225 = vst [vmem:[%s1996_s11 + $0x16] sm:$0x3] %v224_v11  ;;  %v228_v13 = vld [vmem:[%s2000_s14 + $0x34] sm:$0x3]  ;;  %v230_v14 = vld [vmem:[%s2000_s14 + $0x38] sm:$0x3] }
  0x3e   : >> { %227 = vst [vmem:[%s1996_s11 + $0x18] sm:$0x3] %v226_v12  ;;  %229 = vst [vmem:[%s1996_s11 + $0x1a] sm:$0x3] %v228_v13  ;;  %v232_v15 = vld [vmem:[%s2000_s14 + $0x3c] sm:$0x3] }
  0x3f   : >> { %231 = vst [vmem:[%s1996_s11 + $0x1c] sm:$0x3] %v230_v14  ;;  %233 = vst [vmem:[%s1996_s11 + $0x1e] sm:$0x3] %v232_v15  ;;  %s2614_s12 = smov (%p235_p0, %s234_s12), 0  ;;  %s196_s29 = sadd.s32 1, %s2008_s29  }
  0x40   : >> { %s1427_s27 = sshll.u32 %s2614_s12, 6  ;;  %s1428_s30 = sshll.u32 %s2614_s12, 5 }
  0x41   : >> { %s239_s14 = scalar_lea.vmem %s2176_s28, %s1427_s27   ;;  %s240_s11 = scalar_lea.vmem %s2178_s6, %s1428_s30 [#allocation3]  }
  0x42   : >> { %p195_p1 = scmp.ge.s32.totalorder %s196_s29, %s2181_s10  ;;  %s2591_s26 = smov %s2614_s12 }
  0x44   : > { %198 = sbr.rel (!%p195_p1) target bundleno = 53 (0x35), region = 196 }
  0x4b PF: > { %s2253_s5 = sand.u32 15, %s2612_s13   ;;  %s1493_s27 = sshll.u32 %s2181_s10, 6 }
  0x4c   : > { %s2257_s30 = scalar_lea.vmem %s2176_s28, %s1493_s27   ;;  %s1494_s0 = sshll.u32 %s2181_s10, 5 }
  0x4d   : > { %s247_s25 = scalar_lea.vmem %s2178_s6, %s1494_s0 [#allocation3]   ;;  %p1432_p2 = scmp.le.s32.totalorder %s2253_s5, 0 }
  0x4e   : > { %s2010_s12 = smov (!%p1432_p2), %s247_s25   ;;  %s2014_s29 = smov (!%p1432_p2), %s2257_s30  }
  0x4f   : > { %1346 = sbr.rel (%p1432_p2) target bundleno = 96 (0x60), region = 201  ;;  %s2018_s24 = smov (!%p1432_p2), 0  }
  0x50   : > { %s2022_s11 = smov (!%p1432_p2), 0  }
  0x56 LB: >> { %v257_v16 = vld [vmem:[%s2016_s29] sm:$0x3]  ;;  %s259_s13 = sadd.s32 1, %s2020_s24  ;;  %s251_s11 = sadd.s32 1, %s2024_s11   ;;  %s2024_s11 = sphi %s2022_s11, %s251_s11   ;;  %s2020_s24 = sphi %s2018_s24, %s2019_s24   ;;  %s2016_s29 = sphi %s2014_s29, %s264_s29   ;;  %s2012_s12 = sphi %s2010_s12, %s265_s12  }
  0x57   : >> { %258 = vst [vmem:[%s2012_s12] sm:$0x3] %v257_v16  ;;  %p260_p3 = scmp.ge.s32.totalorder %s259_s13, %s2253_s5  ;;  %p250_p4 = scmp.ge.s32.totalorder %s251_s11, %s2253_s5 }
  0x59   : >> { %s2616_s13 = smov (%p260_p3, %s259_s13), 0  ;;  %253 = sbr.rel (!%p250_p4) target bundleno = 86 (0x56), region = 207 }
  0x5a   : >> { %s1433_s0 = sshll.u32 %s2616_s13, 2  ;;  %s1434_s28 = sshll.u32 %s2616_s13, 1 }
  0x5b   : >> { %s264_s29 = scalar_lea.vmem %s2257_s30, %s1433_s0   ;;  %s265_s12 = scalar_lea.vmem %s247_s25, %s1434_s28 [#allocation3]  }
  0x5c   : >> { %s2019_s24 = smov %s2616_s13  }
  0x60 PF: > { %p1435_p5 = scmp.ge.s32.totalorder %s1992_s23, 1  ;;  %p345_p6 = scmp.lt.s32.totalorder %s1992_s23, 5 }
  0x62   : > { %p346_p7 = pnand %p1435_p5, %p345_p6 }
  0x63   : > { %s352_s24 = sand.u32 (!%p346_p7), 1, %s1968_s17   ;;  %s373_s6 = sand.u32 (!%p346_p7), 1, %s1960_s15  }
  0x64   : > { %349 = sbr.rel (%p346_p7) target bundleno = 822 (0x336), region = 80  ;;  %s1436_s10 = sshll.u32 (!%p346_p7), %s352_s24, 5 }
  0x65   : > { %s1437_s14 = sshll.u32 (!%p346_p7), %s373_s6, 7  ;;  %s2270_s26 = scalar_lea.vmem (!%p346_p7), [#allocation3], %s1436_s10 }
  0x66   : > { %s2272_s27 = scalar_lea.vmem (!%p346_p7), [#allocation4], %s1437_s14   ;;  %p1438_p8 = scmp.ne.s32.totalorder (!%p346_p7), %s1976_s19, 0 }
  0x6b   : > { %390 = sbr.rel (%p1438_p8) target bundleno = 116 (0x74), region = 88  ;;  %vm391_vm0 = vcmask (!%p1438_p8), 138240   ;;  %v2058_v17 = vmov (!%p1438_p8), 0.0  }
  0x6c   : > { %392 = vst.msk [vmem:[#allocation2] sm:$0xff] (!%p1438_p8), %vm391_vm0, %v2058_v17  ;;  %393 = vst.msk [vmem:[#allocation2 + $0x8] sm:$0xff] (!%p1438_p8), %vm391_vm0, %v2058_v17 }
  0x6d   : > { %394 = vst.msk [vmem:[#allocation2 + $0x10] sm:$0xff] (!%p1438_p8), %vm391_vm0, %v2058_v17  ;;  %395 = vst.msk [vmem:[#allocation2 + $0x18] sm:$0xff] (!%p1438_p8), %vm391_vm0, %v2058_v17 }
  0x6e   : > { %396 = vst.msk [vmem:[#allocation2 + $0x20] sm:$0xff] (!%p1438_p8), %vm391_vm0, %v2058_v17  ;;  %397 = vst.msk [vmem:[#allocation2 + $0x28] sm:$0xff] (!%p1438_p8), %vm391_vm0, %v2058_v17 }
  0x6f   : > { %398 = vst.msk [vmem:[#allocation2 + $0x30] sm:$0xff] (!%p1438_p8), %vm391_vm0, %v2058_v17  ;;  %399 = vst.msk [vmem:[#allocation2 + $0x38] sm:$0xff] (!%p1438_p8), %vm391_vm0, %v2058_v17 }
  0x70   : > { %400 = vst.msk [vmem:[#allocation2 + $0x40] sm:$0xff] (!%p1438_p8), %vm391_vm0, %v2058_v17  ;;  %401 = vst.msk [vmem:[#allocation2 + $0x48] sm:$0xff] (!%p1438_p8), %vm391_vm0, %v2058_v17 }
  0x71   : > { %402 = vst.msk [vmem:[#allocation2 + $0x50] sm:$0xff] (!%p1438_p8), %vm391_vm0, %v2058_v17  ;;  %403 = vst.msk [vmem:[#allocation2 + $0x58] sm:$0xff] (!%p1438_p8), %vm391_vm0, %v2058_v17 }
  0x72   : > { %404 = vst.msk [vmem:[#allocation2 + $0x60] sm:$0xff] %vm391_vm0, %v2058_v17  ;;  %405 = vst.msk [vmem:[#allocation2 + $0x68] sm:$0xff] %vm391_vm0, %v2058_v17 }
  0x73   : > { %406 = vst.msk [vmem:[#allocation2 + $0x70] sm:$0xff] %vm391_vm0, %v2058_v17  ;;  %407 = vst.msk [vmem:[#allocation2 + $0x78] sm:$0xff] %vm391_vm0, %v2058_v17 }
  0x74 PF: > { %s1439_s15 = sshll.u32 %s1976_s19, 7  ;;  %v408_v18 = vld [vmem:[%s2270_s26] sm:$0x3]  ;;  %v409_v19 = vld [vmem:[%s2270_s26 + $0x2] sm:$0x3]  ;;  %vm686_vm1 = vcmask 138240  }
  0x75   : > { %s441_s17 = sshra.s32 %s1439_s15, 3  ;;  %v424_v20 = vunpack.c.l.s8.bf16 %v408_v18  ;;  %v425_v21 = vunpack.c.l.s8.bf16 %v409_v19  ;;  %v416_v22 = vld [vmem:[%s2270_s26 + $0x10] sm:$0x3]  ;;  %v417_v23 = vld [vmem:[%s2270_s26 + $0x12] sm:$0x3]  ;;  %v461_v4 = vld [vmem:[#allocation2] sm:$0xff] }
  0x76   : > { %s1440_s25 = sshll.u32 %s441_s17, 2  ;;  %v432_v24 = vunpack.c.l.s8.bf16 %v416_v22  ;;  %v433_v25 = vunpack.c.l.s8.bf16 %v417_v23  ;;  %v410_v35 = vld [vmem:[%s2270_s26 + $0x4] sm:$0x3]  ;;  %v411_v36 = vld [vmem:[%s2270_s26 + $0x6] sm:$0x3]  ;;  %v463_v2 = vld [vmem:[#allocation2 + $0x10] sm:$0xff] }
  0x77   : > { %s2299_s12 = scalar_lea.vmem %s2577_s1, %s1440_s25  ;;  %v1441_v26 = vcombine.low %v424_v20, %v425_v21  ;;  %v418_v37 = vld [vmem:[%s2270_s26 + $0x14] sm:$0x3]  ;;  %v419_v39 = vld [vmem:[%s2270_s26 + $0x16] sm:$0x3]  ;;  %v412_v40 = vld [vmem:[%s2270_s26 + $0x8] sm:$0x3]  ;;  %v426_v44 = vunpack.c.l.s8.bf16 %v410_v35  ;;  %v427_v45 = vunpack.c.l.s8.bf16 %v411_v36 }
  0x78   : > { %v1816_v27 = vld [vmem:[%s2299_s12] sm:$0xff]   ;;  %v1817_v28 = vld [vmem:[%s2299_s12 + $0x8] sm:$0xff]   ;;  %v1445_v29 = vcombine.low %v432_v24, %v433_v25  ;;  %v1818_v30 = vld [vmem:[%s2299_s12 + $0x10] sm:$0xff]   ;;  %v434_v46 = vunpack.c.l.s8.bf16 %v418_v37  ;;  %v435_v47 = vunpack.c.l.s8.bf16 %v419_v39  ;;  %v428_v48 = vunpack.c.l.s8.bf16 %v412_v40  ;;  %p1457_p10 = scmp.ne.s32.totalorder %s1976_s19, 1 }
  0x79   : > { %1548 = vmatprep.mubr.bf16.mxu0 %v1441_v26  ;;  %1532 = vmatprep.subr.bf16.mxu0 %v1816_v27  ;;  %v1819_v31 = vld [vmem:[%s2299_s12 + $0x18] sm:$0xff]   ;;  %v1820_v32 = vld [vmem:[%s2299_s12 + $0x20] sm:$0xff]   ;;  %v1821_v33 = vld [vmem:[%s2299_s12 + $0x28] sm:$0xff]   ;;  %v1442_v52 = vcombine.low %v426_v44, %v427_v45  ;;  %vm860_vm2 = vcmask (!%p1457_p10), 130048   ;;  %vm1054_vm3 = vcmask (!%p1457_p10), 261120  }
  0x7a   : > { %1596 = vmatprep.subr.bf16.mxu1 %v1816_v27  ;;  %1533 = vmatpush3.bf16.msra.mxu0 %v1816_v27  ;;  %v1822_v34 = vld [vmem:[%s2299_s12 + $0x30] sm:$0xff]   ;;  %v1823_v38 = vld [vmem:[%s2299_s12 + $0x38] sm:$0xff]   ;;  %v413_v41 = vld [vmem:[%s2270_s26 + $0xa] sm:$0x3]  ;;  %v1446_v53 = vcombine.low %v434_v46, %v435_v47 }
  0x7b   : > { %1604 = vmatpush3.bf16.msra.mxu1 %v1816_v27  ;;  %1534 = vmatprep.subr.bf16.mxu0 %v1817_v28  ;;  %v420_v42 = vld [vmem:[%s2270_s26 + $0x18] sm:$0x3]  ;;  %v421_v43 = vld [vmem:[%s2270_s26 + $0x1a] sm:$0x3]  ;;  %v429_v49 = vunpack.c.l.s8.bf16 %v413_v41  ;;  %v414_v54 = vld [vmem:[%s2270_s26 + $0xc] sm:$0x3] }
  0x7c   : > { %1597 = vmatprep.subr.bf16.mxu1 %v1817_v28  ;;  %1556 = vmatprep.mubr.bf16.mxu1 %v1445_v29  ;;  %v436_v50 = vunpack.c.l.s8.bf16 %v420_v42  ;;  %v437_v51 = vunpack.c.l.s8.bf16 %v421_v43  ;;  %v415_v57 = vld [vmem:[%s2270_s26 + $0xe] sm:$0x3]  ;;  %v422_v58 = vld [vmem:[%s2270_s26 + $0x1c] sm:$0x3]  ;;  %v423_v59 = vld [vmem:[%s2270_s26 + $0x1e] sm:$0x3]  ;;  %v430_v60 = vunpack.c.l.s8.bf16 %v414_v54 }
  0x7d   : > { %v1443_v55 = vcombine.low %v428_v48, %v429_v49  ;;  %v431_v61 = vunpack.c.l.s8.bf16 %v415_v57  ;;  %v438_v62 = vunpack.c.l.s8.bf16 %v422_v58  ;;  %v439_v63 = vunpack.c.l.s8.bf16 %v423_v59  ;;  %v471_v3 = vld [vmem:[#allocation2 + $0x50] sm:$0xff]  ;;  %v469_v5 = vld [vmem:[#allocation2 + $0x40] sm:$0xff]  ;;  %v464_v8 = vld [vmem:[#allocation2 + $0x18] sm:$0xff] }
  0x7e   : > { %1535 = vmatpush3.bf16.msra.mxu0 %v1817_v28  ;;  %v1447_v56 = vcombine.low %v436_v50, %v437_v51  ;;  %v472_v9 = vld [vmem:[#allocation2 + $0x58] sm:$0xff]  ;;  %v462_v14 = vld [vmem:[#allocation2 + $0x8] sm:$0xff]  ;;  %v467_v26 = vld [vmem:[#allocation2 + $0x30] sm:$0xff] }
  0x7f   : > { %1605 = vmatpush3.bf16.msra.mxu1 %v1817_v28  ;;  %1536 = vmatprep.subr.bf16.mxu0 %v1818_v30  ;;  %v1444_v0 = vcombine.low %v430_v60, %v431_v61  ;;  %v1448_v1 = vcombine.low %v438_v62, %v439_v63  ;;  %v470_v15 = vld [vmem:[#allocation2 + $0x48] sm:$0xff]  ;;  %v475_v27 = vld [vmem:[#allocation2 + $0x70] sm:$0xff]  ;;  %v465_v28 = vld [vmem:[#allocation2 + $0x20] sm:$0xff] }
  0x80   : > { %1598 = vmatprep.subr.bf16.mxu1 %v1818_v30  ;;  %v473_v29 = vld [vmem:[#allocation2 + $0x60] sm:$0xff]  ;;  %v474_v39 = vld [vmem:[#allocation2 + $0x68] sm:$0xff] }
  0x82   : > { %1537 = vmatpush3.bf16.msra.mxu0 %v1818_v30 }
  0x83   : > { %1606 = vmatpush3.bf16.msra.mxu1 %v1818_v30  ;;  %1538 = vmatprep.subr.bf16.mxu0 %v1819_v31 }
  0x84   : > { %1599 = vmatprep.subr.bf16.mxu1 %v1819_v31 }
  0x86   : > { %1539 = vmatpush3.bf16.msra.mxu0 %v1819_v31 }
  0x87   : > { %1607 = vmatpush3.bf16.msra.mxu1 %v1819_v31  ;;  %1540 = vmatprep.subr.bf16.mxu0 %v1820_v32 }
  0x88   : > { %1600 = vmatprep.subr.bf16.mxu1 %v1820_v32 }
  0x8a   : > { %1541 = vmatpush3.bf16.msra.mxu0 %v1820_v32 }
  0x8b   : > { %1608 = vmatpush3.bf16.msra.mxu1 %v1820_v32  ;;  %1542 = vmatprep.subr.bf16.mxu0 %v1821_v33  ;;  %v468_v32 = vld [vmem:[#allocation2 + $0x38] sm:$0xff] }
  0x8c   : > { %1601 = vmatprep.subr.bf16.mxu1 %v1821_v33 }
  0x8e   : > { %1543 = vmatpush3.bf16.msra.mxu0 %v1821_v33 }
  0x8f   : > { %1609 = vmatpush3.bf16.msra.mxu1 %v1821_v33  ;;  %1544 = vmatprep.subr.bf16.mxu0 %v1822_v34  ;;  %v476_v33 = vld [vmem:[#allocation2 + $0x78] sm:$0xff] }
  0x90   : > { %1602 = vmatprep.subr.bf16.mxu1 %v1822_v34 }
  0x92   : > { %1545 = vmatpush3.bf16.msra.mxu0 %v1822_v34 }
  0x93   : > { %1610 = vmatpush3.bf16.msra.mxu1 %v1822_v34  ;;  %1546 = vmatprep.subr.bf16.mxu0 %v1823_v38 }
  0x94   : > { %1603 = vmatprep.subr.bf16.mxu1 %v1823_v38 }
  0x96   : > { %1547 = vmatpush3.bf16.msra.mxu0 %v1823_v38 }
  0x97   : > { %1611 = vmatpush3.bf16.msra.mxu1 %v1823_v38  ;;  %v466_v38 = vld [vmem:[#allocation2 + $0x28] sm:$0xff] }
  0x99   : > { %1549 = vmatmul.mubr.bf16.vlgmr.msra.gmra.mrb[0].mxu0 %v1442_v52 }
  0x9a   : > { %1557 = vmatmul.mubr.bf16.vlgmr.msra.gmra.mrb[0].mxu1 %v1446_v53  ;;  %1552 = vmatprep.mubr.bf16.mxu0 %v1443_v55  ;;  %v2059_v53 = vmov (!%p1457_p10), 16  }
  0x9b   : > { %1560 = vmatprep.mubr.bf16.mxu1 %v1447_v56  ;;  %1825 = vset.pattern.permute.xlu1 (!%p1457_p10), %v2059_v53 }
  0x9c   : > { %1824 = vset.pattern.permute.xlu0 (!%p1457_p10), %v2059_v53 }
  0xa1   : > { %1553 = vmatmul.mubr.bf16.gmra.mrb[4].mxu0 %v1444_v0 }
  0xa2   : > { %1561 = vmatmul.mubr.bf16.gmra.mrb[4].mxu1 %v1448_v1 }
 0x16c   : > { %v1550_v6 = vpop.f32.mrb[0].mxu0 }
 0x16d   : > { %v1558_v7 = vpop.f32.mrb[0].mxu1  ;;  %v672_v10 = vadd.f32 %v1550_v6, %v463_v2  ;;  %v607_v12 = vpop.f32.mrb[1].mxu0 }
 0x16e   : > { %v680_v11 = vadd.f32 %v1558_v7, %v471_v3  ;;  %v639_v13 = vpop.f32.mrb[1].mxu1  ;;  %v670_v16 = vadd.f32 %v607_v12, %v461_v4  ;;  %v1551_v18 = vpop.f32.mrb[2].mxu0  ;;  %v851_v3 = vld [vmem:[%s2578_s2] sm:$0xff] (!%p1457_p10)  ;;  %v852_v4 = vld [vmem:[%s2578_s2 + $0x8] sm:$0xff] (!%p1457_p10) }
 0x16f   : > { %v678_v17 = vadd.f32 %v639_v13, %v469_v5  ;;  %v1559_v19 = vpop.f32.mrb[2].mxu1  ;;  %689 = vst.msk [vmem:[#allocation2 + $0x10] sm:$0xff] %vm686_vm1, %v672_v10  ;;  %v673_v20 = vadd.f32 %v1551_v18, %v464_v8  ;;  %v610_v22 = vpop.f32.mrb[3].mxu0  ;;  %v1592_v7 = vpack.c.bf16 (!%p1457_p10), %v852_v4, %v851_v3 }
 0x170   : > { %697 = vst.msk [vmem:[#allocation2 + $0x50] sm:$0xff] %vm686_vm1, %v680_v11  ;;  %v681_v21 = vadd.f32 %v1559_v19, %v472_v9  ;;  %v642_v23 = vpop.f32.mrb[3].mxu1  ;;  %687 = vst.msk [vmem:[#allocation2] sm:$0xff] %vm686_vm1, %v670_v16  ;;  %v671_v24 = vadd.f32 %v610_v22, %v462_v14 }
 0x171   : > { %695 = vst.msk [vmem:[#allocation2 + $0x40] sm:$0xff] %vm686_vm1, %v678_v17  ;;  %v679_v25 = vadd.f32 %v642_v23, %v470_v15  ;;  %690 = vst.msk [vmem:[#allocation2 + $0x18] sm:$0xff] %vm686_vm1, %v673_v20  ;;  %1593 = vmatprep.subr.bf16.mxu0 (!%p1457_p10), %v1592_v7  ;;  %1612 = vmatprep.subr.bf16.mxu1 (!%p1457_p10), %v1592_v7 }
 0x172   : > { %698 = vst.msk [vmem:[#allocation2 + $0x58] sm:$0xff] %vm686_vm1, %v681_v21  ;;  %688 = vst.msk [vmem:[#allocation2 + $0x8] sm:$0xff] %vm686_vm1, %v671_v24  ;;  %1595 = vmatpush3.bf16.msra.mxu0 (!%p1457_p10), %v1592_v7  ;;  %1613 = vmatpush3.bf16.msra.mxu1 (!%p1457_p10), %v1592_v7 }
 0x173   : > { %696 = vst.msk [vmem:[#allocation2 + $0x48] sm:$0xff] %vm686_vm1, %v679_v25 }
 0x174   : > { %v1554_v30 = vpop.f32.mrb[4].mxu0 }
 0x175   : > { %v1562_v31 = vpop.f32.mrb[4].mxu1  ;;  %v676_v34 = vadd.f32 %v1554_v30, %v467_v26  ;;  %v623_v36 = vpop.f32.mrb[5].mxu0  ;;  %706 = sbr.rel (%p1457_p10) target bundleno = 766 (0x2fe), region = 92 }
 0x176   : > { %v684_v35 = vadd.f32 %v1562_v31, %v475_v27  ;;  %v655_v37 = vpop.f32.mrb[5].mxu1  ;;  %v674_v40 = vadd.f32 %v623_v36, %v465_v28  ;;  %v1555_v42 = vpop.f32.mrb[6].mxu0  ;;  %v2352_v60 = vld [vmem:[#allocation2 + $0x10] sm:$0xff] (!%p1457_p10) }
 0x177   : > { %v682_v41 = vadd.f32 %v655_v37, %v473_v29  ;;  %v1563_v43 = vpop.f32.mrb[6].mxu1  ;;  %693 = vst.msk [vmem:[#allocation2 + $0x30] sm:$0xff] %vm686_vm1, %v676_v34  ;;  %v677_v44 = vadd.f32 %v1555_v42, %v468_v32  ;;  %v626_v46 = vpop.f32.mrb[7].mxu0  ;;  %v2340_v51 = vld [vmem:[#allocation2] sm:$0xff] (!%p1457_p10)  ;;  %v2350_v59 = vld [vmem:[#allocation2 + $0x50] sm:$0xff] (!%p1457_p10)  ;;  %v725_v62 = vmax.f32 (!%p1457_p10), %v2352_v60, 1.0 }
 0x178   : > { %701 = vst.msk [vmem:[#allocation2 + $0x70] sm:$0xff] %vm686_vm1, %v684_v35  ;;  %v685_v45 = vadd.f32 %v1563_v43, %v476_v33  ;;  %v658_v47 = vpop.f32.mrb[7].mxu1  ;;  %691 = vst.msk [vmem:[#allocation2 + $0x20] sm:$0xff] %vm686_vm1, %v674_v40  ;;  %v675_v48 = vadd.f32 %v626_v46, %v466_v38  ;;  %v723_v55 = vmax.f32 (!%p1457_p10), %v2340_v51, 1.0  ;;  %v2346_v56 = vld [vmem:[#allocation2 + $0x40] sm:$0xff] (!%p1457_p10)  ;;  %v733_v61 = vmax.f32 (!%p1457_p10), %v2350_v59, 1.0 }
 0x179   : > { %699 = vst.msk [vmem:[#allocation2 + $0x60] sm:$0xff] %vm686_vm1, %v682_v41  ;;  %v683_v49 = vadd.f32 %v658_v47, %v474_v39  ;;  %694 = vst.msk [vmem:[#allocation2 + $0x38] sm:$0xff] %vm686_vm1, %v677_v44  ;;  %v2338_v50 = vld [vmem:[#allocation2 + $0x8] sm:$0xff] (!%p1457_p10)  ;;  %v731_v58 = vmax.f32 (!%p1457_p10), %v2346_v56, 1.0  ;;  %v2356_v63 = vld [vmem:[#allocation2 + $0x58] sm:$0xff] (!%p1457_p10) }
 0x17a   : > { %702 = vst.msk [vmem:[#allocation2 + $0x78] sm:$0xff] %vm686_vm1, %v685_v45  ;;  %692 = vst.msk [vmem:[#allocation2 + $0x28] sm:$0xff] %vm686_vm1, %v675_v48  ;;  %v2342_v52 = vld [vmem:[#allocation2 + $0x48] sm:$0xff] (!%p1457_p10)  ;;  %v724_v54 = vmax.f32 (!%p1457_p10), %v2338_v50, 1.0  ;;  %741 = vperm.xlu0 (!%p1457_p10), %1824, %v723_v55   ;;  %v2358_v0 = vld [vmem:[#allocation2 + $0x18] sm:$0xff] (!%p1457_p10)  ;;  %v734_v1 = vmax.f32 (!%p1457_p10), %v2356_v63, 1.0 }
 0x17b   : > { %700 = vst.msk [vmem:[#allocation2 + $0x68] sm:$0xff] %vm686_vm1, %v683_v49  ;;  %v732_v57 = vmax.f32 (!%p1457_p10), %v2342_v52, 1.0  ;;  %v726_v2 = vmax.f32 (!%p1457_p10), %v2358_v0, 1.0 }
 0x17c   : > { %746 = vperm.xlu1 %1825, %v724_v54  }
 0x17e   : > { %781 = vperm.xlu0 %1824, %v731_v58   ;;  %v2382_v15 = vld [vmem:[#allocation2 + $0x30] sm:$0xff] }
 0x17f   : > { %v2370_v6 = vld [vmem:[#allocation2 + $0x20] sm:$0xff]  ;;  %v2380_v14 = vld [vmem:[#allocation2 + $0x70] sm:$0xff]  ;;  %v729_v17 = vmax.f32 %v2382_v15, 1.0 }
 0x180   : > { %786 = vperm.xlu1 %1825, %v732_v57   ;;  %v2368_v5 = vld [vmem:[#allocation2 + $0x60] sm:$0xff]  ;;  %v727_v9 = vmax.f32 %v2370_v6, 1.0  ;;  %v737_v16 = vmax.f32 %v2380_v14, 1.0  ;;  %v2388_v19 = vld [vmem:[#allocation2 + $0x38] sm:$0xff] }
 0x181   : > { %v735_v8 = vmax.f32 %v2368_v5, 1.0  ;;  %v2376_v11 = vld [vmem:[#allocation2 + $0x28] sm:$0xff]  ;;  %v2386_v18 = vld [vmem:[#allocation2 + $0x78] sm:$0xff]  ;;  %v730_v21 = vmax.f32 %v2388_v19, 1.0 }
 0x182   : > { %751 = vperm.xlu0 %1824, %v725_v62   ;;  %v2374_v10 = vld [vmem:[#allocation2 + $0x68] sm:$0xff]  ;;  %v728_v13 = vmax.f32 %v2376_v11, 1.0  ;;  %v738_v20 = vmax.f32 %v2386_v18, 1.0 }
 0x183   : > { %v736_v12 = vmax.f32 %v2374_v10, 1.0 }
 0x184   : > { %791 = vperm.xlu1 %1825, %v733_v61  }
 0x186   : > { %756 = vperm.xlu0 %1824, %v726_v2  }
 0x188   : > { %796 = vperm.xlu1 %1825, %v734_v1  }
 0x18a   : > { %761 = vperm.xlu0 %1824, %v727_v9  }
 0x18c   : > { %801 = vperm.xlu1 %1825, %v735_v8  }
 0x18e   : > { %766 = vperm.xlu0 %1824, %v728_v13  }
 0x190   : > { %806 = vperm.xlu1 %1825, %v736_v12  }
 0x192   : > { %771 = vperm.xlu0 %1824, %v729_v17  }
 0x194   : > { %811 = vperm.xlu1 %1825, %v737_v16  }
 0x196   : > { %776 = vperm.xlu0 %1824, %v730_v21  }
 0x198   : > { %816 = vperm.xlu1 %1825, %v738_v20  }
 0x1f9   : > { %v742_v23 = vpop.permute.xlu0 %741 }
 0x1fb   : > { %v747_v22 = vpop.permute.xlu1 %746 }
 0x1fc   : > { %1826 = vrcp.f32 %v747_v22 }
 0x1fd   : > { %1828 = vrcp.f32 %v742_v23  ;;  %v782_v25 = vpop.permute.xlu0 %781 }
 0x1ff   : > { %v787_v24 = vpop.permute.xlu1 %786 }
 0x200   : > { %1830 = vrcp.f32 %v787_v24 }
 0x201   : > { %1832 = vrcp.f32 %v782_v25  ;;  %v752_v27 = vpop.permute.xlu0 %751 }
 0x203   : > { %v792_v26 = vpop.permute.xlu1 %791 }
 0x204   : > { %1834 = vrcp.f32 %v792_v26 }
 0x205   : > { %1836 = vrcp.f32 %v752_v27  ;;  %v757_v31 = vpop.permute.xlu0 %756 }
 0x206   : > { %v1827_v28 = vpop.eup %1826 }
 0x207   : > { %v1829_v29 = vpop.eup %1828  ;;  %v797_v30 = vpop.permute.xlu1 %796  ;;  %v822_v32 = vmul.f32 %v1827_v28, %v2338_v50 }
 0x208   : > { %1838 = vrcp.f32 %v797_v30  ;;  %v820_v33 = vmul.f32 %v1829_v29, %v2340_v51 }
 0x209   : > { %1840 = vrcp.f32 %v757_v31  ;;  %v762_v37 = vpop.permute.xlu0 %761 }
 0x20a   : > { %v1831_v34 = vpop.eup %1830  ;;  %1568 = vmatprep.mubr.msk.f32.mxu0 %vm860_vm2, %v820_v33 }
 0x20b   : > { %v1833_v35 = vpop.eup %1832  ;;  %1569 = vmatmul.mubr.msk.f32.vlgmr.msra.gmra.mrb[0].mxu0 %vm860_vm2, %v822_v32  ;;  %v802_v36 = vpop.permute.xlu1 %801  ;;  %v838_v38 = vmul.f32 %v1831_v34, %v2342_v52 }
 0x20c   : > { %1842 = vrcp.f32 %v802_v36  ;;  %v836_v39 = vmul.f32 %v1833_v35, %v2346_v56 }
 0x20d   : > { %1844 = vrcp.f32 %v762_v37  ;;  %v767_v43 = vpop.permute.xlu0 %766 }
 0x20e   : > { %v1835_v40 = vpop.eup %1834  ;;  %1580 = vmatprep.mubr.msk.f32.mxu1 %vm860_vm2, %v836_v39 }
 0x20f   : > { %v1837_v41 = vpop.eup %1836  ;;  %1581 = vmatmul.mubr.msk.f32.vlgmr.msra.gmra.mrb[0].mxu1 %vm860_vm2, %v838_v38  ;;  %v807_v42 = vpop.permute.xlu1 %806  ;;  %v840_v44 = vmul.f32 %v1835_v40, %v2350_v59 }
 0x210   : > { %1846 = vrcp.f32 %v807_v42  ;;  %v824_v45 = vmul.f32 %v1837_v41, %v2352_v60 }
 0x211   : > { %1848 = vrcp.f32 %v767_v43  ;;  %1583 = vmatprep.mubr.msk.f32.mxu1 %vm860_vm2, %v840_v44  ;;  %v772_v49 = vpop.permute.xlu0 %771 }
 0x212   : > { %v1839_v46 = vpop.eup %1838  ;;  %1571 = vmatprep.mubr.msk.f32.mxu0 %vm860_vm2, %v824_v45 }
 0x213   : > { %v1841_v47 = vpop.eup %1840  ;;  %v812_v48 = vpop.permute.xlu1 %811  ;;  %v842_v50 = vmul.f32 %v1839_v46, %v2356_v63 }
 0x214   : > { %1850 = vrcp.f32 %v812_v48  ;;  %v826_v51 = vmul.f32 %v1841_v47, %v2358_v0 }
 0x215   : > { %1852 = vrcp.f32 %v772_v49  ;;  %1584 = vmatmul.mubr.msk.f32.gmra.mrb[2].mxu1 %vm860_vm2, %v842_v50  ;;  %v777_v55 = vpop.permute.xlu0 %776 }
 0x216   : > { %v1843_v52 = vpop.eup %1842  ;;  %1572 = vmatmul.mubr.msk.f32.gmra.mrb[2].mxu0 %vm860_vm2, %v826_v51 }
 0x217   : > { %v1845_v53 = vpop.eup %1844  ;;  %v817_v54 = vpop.permute.xlu1 %816  ;;  %v844_v56 = vmul.f32 %v1843_v52, %v2368_v5 }
 0x218   : > { %1854 = vrcp.f32 %v817_v54  ;;  %v828_v57 = vmul.f32 %v1845_v53, %v2370_v6  ;;  %v1458_v6 = vld [vmem:[%s2579_s3] ss:$0 sm:$0xff] }
 0x219   : > { %1856 = vrcp.f32 %v777_v55  ;;  %1586 = vmatprep.mubr.msk.f32.mxu1 %vm860_vm2, %v844_v56 }
 0x21a   : > { %v1847_v58 = vpop.eup %1846  ;;  %1574 = vmatprep.mubr.msk.f32.mxu0 %vm860_vm2, %v828_v57 }
 0x21b   : > { %v1849_v59 = vpop.eup %1848  ;;  %v846_v60 = vmul.f32 %v1847_v58, %v2374_v10 }
 0x21c   : > { %v830_v61 = vmul.f32 %v1849_v59, %v2376_v11 }
 0x21d   : > { %1587 = vmatmul.mubr.msk.f32.gmra.mrb[4].mxu1 %vm860_vm2, %v846_v60 }
 0x21e   : > { %v1851_v62 = vpop.eup %1850  ;;  %1575 = vmatmul.mubr.msk.f32.gmra.mrb[4].mxu0 %vm860_vm2, %v830_v61 }
 0x21f   : > { %v1853_v63 = vpop.eup %1852  ;;  %v848_v0 = vmul.f32 %v1851_v62, %v2380_v14 }
 0x220   : > { %v832_v1 = vmul.f32 %v1853_v63, %v2382_v15 }
 0x221   : > { %1589 = vmatprep.mubr.msk.f32.mxu1 %vm860_vm2, %v848_v0 }
 0x222   : > { %v1855_v2 = vpop.eup %1854  ;;  %1577 = vmatprep.mubr.msk.f32.mxu0 %vm860_vm2, %v832_v1 }
 0x223   : > { %v1857_v3 = vpop.eup %1856  ;;  %v850_v4 = vmul.f32 %v1855_v2, %v2386_v18 }
 0x224   : > { %v834_v5 = vmul.f32 %v1857_v3, %v2388_v19 }
 0x225   : > { %1590 = vmatmul.mubr.msk.f32.gmra.mrb[6].mxu1 %vm860_vm2, %v850_v4 }
 0x226   : > { %1578 = vmatmul.mubr.msk.f32.gmra.mrb[6].mxu0 %vm860_vm2, %v834_v5 }
 0x2de   : > { %v1570_v7 = vpop.f32.mrb[0].mxu0 }
 0x2df   : > { %v981_v8 = vadd.f32 %v1570_v7, %v1458_v6  ;;  %v975_v9 = vpop.f32.mrb[1].mxu0 }
 0x2e0   : > { %v976_v10 = vadd.f32 %v1458_v6, %v975_v9 }
 0x2e1   : > { %1056 = vst.msk [vmem:[%s2272_s27 + $0x8] sm:$0xff] %vm1054_vm3, %v981_v8 }
 0x2e2   : > { %1055 = vst.msk [vmem:[%s2272_s27] sm:$0xff] %vm1054_vm3, %v976_v10  ;;  %v1582_v11 = vpop.f32.mrb[0].mxu1 }
 0x2e3   : > { %v1021_v12 = vadd.f32 %v1582_v11, %v1458_v6  ;;  %v1015_v13 = vpop.f32.mrb[1].mxu1 }
 0x2e4   : > { %v1016_v14 = vadd.f32 %v1458_v6, %v1015_v13 }
 0x2e5   : > { %1064 = vst.msk [vmem:[%s2272_s27 + $0x48] sm:$0xff] %vm1054_vm3, %v1021_v12 }
 0x2e6   : > { %1063 = vst.msk [vmem:[%s2272_s27 + $0x40] sm:$0xff] %vm1054_vm3, %v1016_v14 }
 0x2e8   : > { %v1585_v15 = vpop.f32.mrb[2].mxu1 }
 0x2e9   : > { %v1573_v16 = vpop.f32.mrb[2].mxu0  ;;  %v1031_v17 = vadd.f32 %v1585_v15, %v1458_v6  ;;  %v1025_v18 = vpop.f32.mrb[3].mxu1 }
 0x2ea   : > { %v991_v19 = vadd.f32 %v1573_v16, %v1458_v6  ;;  %v985_v20 = vpop.f32.mrb[3].mxu0  ;;  %v1026_v21 = vadd.f32 %v1458_v6, %v1025_v18 }
 0x2eb   : > { %1066 = vst.msk [vmem:[%s2272_s27 + $0x58] sm:$0xff] %vm1054_vm3, %v1031_v17  ;;  %v986_v22 = vadd.f32 %v1458_v6, %v985_v20 }
 0x2ec   : > { %1058 = vst.msk [vmem:[%s2272_s27 + $0x18] sm:$0xff] %vm1054_vm3, %v991_v19  ;;  %1065 = vst.msk [vmem:[%s2272_s27 + $0x50] sm:$0xff] %vm1054_vm3, %v1026_v21 }
 0x2ed   : > { %1057 = vst.msk [vmem:[%s2272_s27 + $0x10] sm:$0xff] %vm1054_vm3, %v986_v22 }
 0x2f0   : > { %v1588_v23 = vpop.f32.mrb[4].mxu1 }
 0x2f1   : > { %v1576_v24 = vpop.f32.mrb[4].mxu0  ;;  %v1041_v25 = vadd.f32 %v1588_v23, %v1458_v6  ;;  %v1035_v26 = vpop.f32.mrb[5].mxu1 }
 0x2f2   : > { %v1001_v27 = vadd.f32 %v1576_v24, %v1458_v6  ;;  %v995_v28 = vpop.f32.mrb[5].mxu0  ;;  %v1036_v29 = vadd.f32 %v1458_v6, %v1035_v26 }
 0x2f3   : > { %1068 = vst.msk [vmem:[%s2272_s27 + $0x68] sm:$0xff] %vm1054_vm3, %v1041_v25  ;;  %v996_v30 = vadd.f32 %v1458_v6, %v995_v28 }
 0x2f4   : > { %1060 = vst.msk [vmem:[%s2272_s27 + $0x28] sm:$0xff] %vm1054_vm3, %v1001_v27  ;;  %1067 = vst.msk [vmem:[%s2272_s27 + $0x60] sm:$0xff] %vm1054_vm3, %v1036_v29 }
 0x2f5   : > { %1059 = vst.msk [vmem:[%s2272_s27 + $0x20] sm:$0xff] %vm1054_vm3, %v996_v30 }
 0x2f8   : > { %v1591_v31 = vpop.f32.mrb[6].mxu1 }
 0x2f9   : > { %v1579_v32 = vpop.f32.mrb[6].mxu0  ;;  %v1051_v33 = vadd.f32 %v1591_v31, %v1458_v6  ;;  %v1045_v34 = vpop.f32.mrb[7].mxu1 }
 0x2fa   : > { %v1011_v35 = vadd.f32 %v1579_v32, %v1458_v6  ;;  %v1005_v36 = vpop.f32.mrb[7].mxu0  ;;  %v1046_v37 = vadd.f32 %v1458_v6, %v1045_v34 }
 0x2fb   : > { %1070 = vst.msk [vmem:[%s2272_s27 + $0x78] sm:$0xff] %vm1054_vm3, %v1051_v33  ;;  %v1006_v38 = vadd.f32 %v1458_v6, %v1005_v36 }
 0x2fc   : > { %1062 = vst.msk [vmem:[%s2272_s27 + $0x38] sm:$0xff] %vm1054_vm3, %v1011_v35  ;;  %1069 = vst.msk [vmem:[%s2272_s27 + $0x70] sm:$0xff] %vm1054_vm3, %v1046_v37 }
 0x2fd   : > { %1061 = vst.msk [vmem:[%s2272_s27 + $0x30] sm:$0xff] %vm1054_vm3, %v1006_v38 }
 0x2fe PF: > { %1077 = sbr.rel (!%p2153_p9) target bundleno = 822 (0x336), region = 96  ;;  %s1476_s24 = sshll.u32 (%p2153_p9), %s1980_s20, 4 }
 0x2ff   : > { %s1495_s6 = sshll.u32 (%p2153_p9), %s1980_s20, 7  ;;  %s1079_s10 = ssub.s32 (%p2153_p9), 25, %s1476_s24 }
 0x300   : > { %s2466_s15 = scalar_lea.vmem (%p2153_p9), %s2580_s4, %s1495_s6   ;;  %p1080_p11 = scmp.lt.s32.totalorder (%p2153_p9), %s1079_s10, 16 }
 0x305   : > { %s2618_s10 = smov (!%p1080_p11, %s1079_s10), 16 }
 0x306   : > { %s1477_s17 = sshll.u32 %s2618_s10, 7 }
 0x307   : > { %p1480_p12 = scmp.eq.s32.totalorder %s1477_s17, 0 }
 0x308   : > { %s2472_s7 = sshrl.u32 (!%p1480_p12), %s2618_s10, 4 }
 0x309   : > { %1088 = sbr.rel (%p1480_p12) target bundleno = 822 (0x336), region = 100  ;;  %p1481_p9 = scmp.le.s32.totalorder (!%p1480_p12), %s2472_s7, 0 }
 0x310   : > { %1360 = sbr.rel (%p1481_p9) target bundleno = 801 (0x321), region = 212  ;;  %s2592_s20 = smov (!%p1481_p9), %s2466_s15 }
 0x311   : > { %s2593_s25 = smov (!%p1481_p9), %s2272_s27  ;;  %s2481_s5 = smov (!%p1481_p9), 0  }
 0x312   : > { %s2483_s30 = smov (!%p1481_p9), 0  }
 0x317 LB: >> { %v1180_v39 = vld [vmem:[%s2032_s25] sm:$0xff]  ;;  %v1182_v40 = vld [vmem:[%s2032_s25 + $0x8] sm:$0xff]  ;;  %v1184_v41 = vld [vmem:[%s2032_s25 + $0x10] sm:$0xff]  ;;  %s1212_s12 = sadd.s32 1, %s2036_s5  ;;  %s1174_s30 = sadd.s32 1, %s2040_s30   ;;  %s2040_s30 = sphi %s2483_s30, %s1174_s30   ;;  %s2036_s5 = sphi %s2481_s5, %s2594_s5   ;;  %s2032_s25 = sphi %s2593_s25, %s1217_s25   ;;  %s2028_s20 = sphi %s2592_s20, %s1218_s20  }
 0x318   : >> { %1181 = vst [vmem:[%s2028_s20] sm:$0xff] %v1180_v39  ;;  %1183 = vst [vmem:[%s2028_s20 + $0x8] sm:$0xff] %v1182_v40  ;;  %v1186_v42 = vld [vmem:[%s2032_s25 + $0x18] sm:$0xff]  ;;  %v1188_v43 = vld [vmem:[%s2032_s25 + $0x20] sm:$0xff]  ;;  %p1213_p13 = scmp.ge.s32.totalorder %s1212_s12, %s2472_s7  ;;  %p1173_p0 = scmp.ge.s32.totalorder %s1174_s30, %s2472_s7 }
 0x319   : >> { %1185 = vst [vmem:[%s2028_s20 + $0x10] sm:$0xff] %v1184_v41  ;;  %v1190_v44 = vld [vmem:[%s2032_s25 + $0x28] sm:$0xff]  ;;  %1187 = vst [vmem:[%s2028_s20 + $0x18] sm:$0xff] %v1186_v42  ;;  %v1192_v45 = vld [vmem:[%s2032_s25 + $0x30] sm:$0xff] }
 0x31a   : >> { %1189 = vst [vmem:[%s2028_s20 + $0x20] sm:$0xff] %v1188_v43  ;;  %1191 = vst [vmem:[%s2028_s20 + $0x28] sm:$0xff] %v1190_v44  ;;  %v1194_v46 = vld [vmem:[%s2032_s25 + $0x38] sm:$0xff]  ;;  %v1196_v47 = vld [vmem:[%s2032_s25 + $0x40] sm:$0xff]  ;;  %s2620_s12 = smov (%p1213_p13, %s1212_s12), 0  ;;  %1176 = sbr.rel (!%p1173_p0) target bundleno = 791 (0x317), region = 218 }
 0x31b   : >> { %1193 = vst [vmem:[%s2028_s20 + $0x30] sm:$0xff] %v1192_v45  ;;  %1195 = vst [vmem:[%s2028_s20 + $0x38] sm:$0xff] %v1194_v46  ;;  %v1198_v48 = vld [vmem:[%s2032_s25 + $0x48] sm:$0xff]  ;;  %v1200_v49 = vld [vmem:[%s2032_s25 + $0x50] sm:$0xff]  ;;  %s1482_s19 = sshll.u32 %s2620_s12, 7  ;;  %s2594_s5 = smov %s2620_s12 }
 0x31c   : >> { %1197 = vst [vmem:[%s2028_s20 + $0x40] sm:$0xff] %v1196_v47  ;;  %v1202_v50 = vld [vmem:[%s2032_s25 + $0x58] sm:$0xff]  ;;  %1199 = vst [vmem:[%s2028_s20 + $0x48] sm:$0xff] %v1198_v48  ;;  %v1204_v51 = vld [vmem:[%s2032_s25 + $0x60] sm:$0xff] }
 0x31d   : >> { %1201 = vst [vmem:[%s2028_s20 + $0x50] sm:$0xff] %v1200_v49  ;;  %1203 = vst [vmem:[%s2028_s20 + $0x58] sm:$0xff] %v1202_v50  ;;  %v1206_v52 = vld [vmem:[%s2032_s25 + $0x68] sm:$0xff]  ;;  %v1208_v53 = vld [vmem:[%s2032_s25 + $0x70] sm:$0xff] }
 0x31e   : >> { %1205 = vst [vmem:[%s2028_s20 + $0x60] sm:$0xff] %v1204_v51  ;;  %1207 = vst [vmem:[%s2028_s20 + $0x68] sm:$0xff] %v1206_v52  ;;  %v1210_v54 = vld [vmem:[%s2032_s25 + $0x78] sm:$0xff]  ;;  %s1217_s25 = scalar_lea.vmem %s2272_s27, %s1482_s19 [#allocation4]  }
 0x31f   : >> { %1209 = vst [vmem:[%s2028_s20 + $0x70] sm:$0xff] %v1208_v53  ;;  %1211 = vst [vmem:[%s2028_s20 + $0x78] sm:$0xff] %v1210_v54  ;;  %s1218_s20 = scalar_lea.vmem %s2466_s15, %s1482_s19  }
 0x321 PF: > { %s2541_s29 = sand.u32 15, %s2618_s10   ;;  %s1496_s11 = sshll.u32 %s2472_s7, 7 }
 0x322   : > { %s1223_s13 = scalar_lea.vmem %s2272_s27, %s1496_s11 [#allocation4]   ;;  %s1225_s0 = scalar_lea.vmem %s2466_s15, %s1496_s11  }
 0x323   : > { %p1487_p1 = scmp.le.s32.totalorder %s2541_s29, 0 }
 0x324   : > { %s2042_s28 = smov (!%p1487_p1), %s1225_s0   ;;  %s2046_s24 = smov (!%p1487_p1), %s1223_s13  }
 0x325   : > { %1374 = sbr.rel (%p1487_p1) target bundleno = 822 (0x336), region = 223  ;;  %s2050_s6 = smov (!%p1487_p1), 0  }
 0x326   : > { %s2054_s14 = smov (!%p1487_p1), 0  }
 0x32c LB: >> { %v1235_v55 = vld [vmem:[%s2048_s24] sm:$0xff]  ;;  %s1237_s10 = sadd.s32 1, %s2052_s6  ;;  %s1229_s14 = sadd.s32 1, %s2056_s14   ;;  %s2056_s14 = sphi %s2054_s14, %s1229_s14   ;;  %s2052_s6 = sphi %s2050_s6, %s2051_s6   ;;  %s2048_s24 = sphi %s2046_s24, %s1242_s24   ;;  %s2044_s28 = sphi %s2042_s28, %s1243_s28  }
 0x32d   : >> { %1236 = vst [vmem:[%s2044_s28] sm:$0xff] %v1235_v55  ;;  %p1238_p2 = scmp.ge.s32.totalorder %s1237_s10, %s2541_s29  ;;  %p1228_p3 = scmp.ge.s32.totalorder %s1229_s14, %s2541_s29 }
 0x32f   : >> { %s2622_s10 = smov (%p1238_p2, %s1237_s10), 0  ;;  %1231 = sbr.rel (!%p1228_p3) target bundleno = 812 (0x32c), region = 229 }
 0x330   : >> { %s1488_s27 = sshll.u32 %s2622_s10, 3  ;;  %s2051_s6 = smov %s2622_s10  }
 0x331   : >> { %s1242_s24 = scalar_lea.vmem %s1223_s13, %s1488_s27 [#allocation4]   ;;  %s1243_s28 = scalar_lea.vmem %s1225_s0, %s1488_s27  }
 0x336 PF: > { %s14_s23 = sadd.s32 1, %s1992_s23   ;;  %s2595_s26 = sld [smem:[#allocation5_spill]] }
 0x337   : > { %p11_p4 = scmp.ge.s32.totalorder %s14_s23, 6   ;;  %s2596_s7 = sld [smem:[#allocation6_spill]] }
 0x338   : > { %s2597_s15 = smov %s1964_s16  ;;  %s2598_s16 = smov %s2158_s8 }
 0x339   : > { %s2599_s17 = smov %s1972_s18  ;;  %s2600_s18 = smov %s2161_s9 }
 0x33a   : > { %s2601_s19 = smov %s1984_s21  ;;  %s2602_s20 = smov %s1988_s22 }
 0x33b   :  { %13 = sbr.rel (!%p11_p4) target bundleno = 7 (0x7), region = 240 }
 0x33c   : > { %s2603_s21 = smov %s2595_s26 }
 0x33d   : > { %s2604_s22 = smov %s2596_s7 }

</bundles_post_ra>
